<compile_context>
chip_gen: v7x
topology: tpu7x:2x2x1
jax: 0.10.0
libtpu: 0.0.40
codegen_flags: <defaults>
</compile_context>

<pallas_src>
import functools

import jax
import jax.numpy as jnp
from jax.experimental import pallas as pl
from jax.experimental.pallas import tpu as pltpu


def _focal_loss_kernel(x_ref, t_ref, a_ref, out_ref, acc_ref, *,
                       gamma, s_actual, tile_s, m_total, size_average,
                       mask_ragged):
    bi = pl.program_id(0)
    si = pl.program_id(1)
    nb = pl.num_programs(0)
    ns = pl.num_programs(1)

    @pl.when(jnp.logical_and(bi == 0, si == 0))
    def _init():
        acc_ref[...] = jnp.zeros_like(acc_ref)

    x = x_ref[0].astype(jnp.float32)          # (C, tile_s): classes on sublanes
    t = t_ref[0]                              # (1, tile_s) int32
    alpha = a_ref[...].astype(jnp.float32)    # (C, 1)

    # Numerically-stable softmax pieces, reduced over the class (sublane) axis.
    m = jnp.max(x, axis=0, keepdims=True)               # (1, tile_s)
    e = jnp.exp(x - m)                                   # (C, tile_s)   EUP
    sumexp = jnp.sum(e, axis=0, keepdims=True)           # (1, tile_s)
    log_sumexp = jnp.log(sumexp)                         # (1, tile_s)   EUP

    # One-hot of the target class along the sublane axis.
    class_ids = jax.lax.broadcasted_iota(jnp.int32, x.shape, 0)
    onehot = class_ids == t                               # (C, tile_s)

    # pt = softmax(x)[target]; reuse exp(x - m) instead of a second exp(logpt).
    e_t = jnp.sum(jnp.where(onehot, e, 0.0), axis=0, keepdims=True)
    pt = e_t / sumexp                                     # (1, tile_s)

    # alpha[target] * logpt with a single fused one-hot select:
    #   sum(onehot * logp * alpha) == logpt * alpha[target]
    logp = x - m - log_sumexp                             # (C, tile_s)
    logpt_w = jnp.sum(jnp.where(onehot, logp * alpha, 0.0),
                      axis=0, keepdims=True)              # (1, tile_s)

    one_minus_pt = jnp.maximum(1.0 - pt, 0.0)   # clamp: no NaN from pow
    g = float(gamma)
    if g.is_integer() and 0.0 <= g <= 8.0:
        gi = int(g)
        if gi == 0:
            focal = jnp.ones_like(one_minus_pt)
        else:
            focal = one_minus_pt
            for _ in range(gi - 1):               # repeated multiply on VALU
                focal = focal * one_minus_pt
    else:
        focal = jnp.power(one_minus_pt, g)

    loss = -focal * logpt_w                               # (1, tile_s)

    if mask_ragged:
        col = si * tile_s + jax.lax.broadcasted_iota(jnp.int32, loss.shape, 1)
        loss = jnp.where(col < s_actual, loss, 0.0)

    # Lane-dense accumulation: per-lane VALU add each step.
    acc_ref[...] += loss

    @pl.when(jnp.logical_and(bi == nb - 1, si == ns - 1))
    def _finalize():
        total = jnp.sum(acc_ref[...], axis=1, keepdims=True)   # (1, 1)
        if size_average:
            total = total / jnp.float32(m_total)
        out_ref[...] = total


def focal_loss(logits, target, gamma=2.0, alpha=None, size_average=True,
               max_tile_s=8192, vmem_tile_budget_bytes=8 * 1024 * 1024):
    """Pallas TPU FocalLoss forward.

    logits: (N, C) or (N, C, *spatial) float array (class axis 1 for ndim>2).
    target: integer class indices with the same leading/spatial dims as logits
            minus the class axis.
    """
    logits = jnp.asarray(logits)
    target = jnp.asarray(target)

    if logits.ndim > 2:
        # NCHW-style input: consume directly as (N, C, S). The reshape is a
        # free view of contiguous memory -- no transpose pass through HBM.
        b, c = logits.shape[0], logits.shape[1]
        x = logits.reshape(b, c, -1)
    else:
        # Already-flat (M, C) input: class axis is last in memory, present it
        # to the kernel as (1, C, M) (single transpose, only for this case).
        c = logits.shape[1]
        x = jnp.transpose(logits, (1, 0))[None]
        b = 1
    s = x.shape[2]
    m_total = b * s

    t = target.reshape(b, 1, s).astype(jnp.int32)

    # alpha handling mirrors the torch constructor.
    if alpha is None:
        alpha_vec = jnp.ones((c,), dtype=jnp.float32)
    elif isinstance(alpha, (float, int)):
        # Binary [alpha, 1 - alpha]; classes >= 2 get weight 0 (same
        # binary-alpha assumption as the original module).
        vals = [float(alpha), 1.0 - float(alpha)] + [0.0] * max(0, c - 2)
        alpha_vec = jnp.array(vals[:c], dtype=jnp.float32)
    else:
        alpha_vec = jnp.asarray(alpha, dtype=jnp.float32).reshape(-1)
    alpha_vec = alpha_vec.reshape(c, 1)

    # Spatial tile size: as large as possible (amortize per-step overhead)
    # while keeping the double-buffered logits tile well inside the smallest
    # default scoped-VMEM budget across TPU generations.
    itemsize = jnp.dtype(x.dtype).itemsize
    budget_tile = vmem_tile_budget_bytes // (2 * c * itemsize)
    budget_tile = max(128, (budget_tile // 128) * 128)
    tile_s = min(int(max_tile_s), int(budget_tile))
    if s <= tile_s:
        tile_s = s                                  # full-extent block: legal
    else:
        tile_s = max(128, (tile_s // 128) * 128)    # 128-lane aligned tiles
    n_s = -(-s // tile_s)
    mask_ragged = (s % tile_s) != 0

    kernel = functools.partial(
        _focal_loss_kernel,
        gamma=float(gamma), s_actual=s, tile_s=tile_s, m_total=m_total,
        size_average=bool(size_average), mask_ragged=mask_ragged)

    out = pl.pallas_call(
        kernel,
        out_shape=jax.ShapeDtypeStruct((1, 1), jnp.float32),
        grid_spec=pltpu.PrefetchScalarGridSpec(
            num_scalar_prefetch=0,
            grid=(b, n_s),
            in_specs=[
                pl.BlockSpec((1, c, tile_s), lambda bi, si: (bi, 0, si)),
                pl.BlockSpec((1, 1, tile_s), lambda bi, si: (bi, 0, si)),
                pl.BlockSpec((c, 1), lambda bi, si: (0, 0)),
            ],
            out_specs=pl.BlockSpec((1, 1), lambda bi, si: (0, 0)),
            scratch_shapes=[pltpu.VMEM((1, tile_s), jnp.float32)],
        ),
        compiler_params=pltpu.CompilerParams(
            dimension_semantics=("arbitrary", "arbitrary")),
    )(x, t, alpha_vec)
    return out[0, 0]


def _focal_loss_ref(logits, target, gamma=2.0, alpha=None, size_average=True):
    """Pure-JAX reference mirroring the PyTorch forward."""
    if logits.ndim > 2:
        n, c = logits.shape[0], logits.shape[1]
        x = jnp.transpose(logits.reshape(n, c, -1), (0, 2, 1)).reshape(-1, c)
    else:
        x = logits
    t = target.reshape(-1)
    logp = jax.nn.log_softmax(x, axis=-1)
    logpt = jnp.take_along_axis(logp, t[:, None], axis=1)[:, 0]
    pt = jnp.exp(logpt)
    if alpha is not None:
        if isinstance(alpha, (float, int)):
            a = jnp.array([alpha, 1.0 - alpha], dtype=x.dtype)
            a = jnp.pad(a, (0, max(0, x.shape[1] - 2)))
        else:
            a = jnp.asarray(alpha, dtype=x.dtype)
        logpt = logpt * a[t]
    loss = -1.0 * (1.0 - pt) ** gamma * logpt
    return jnp.mean(loss) if size_average else jnp.sum(loss)


if __name__ == "__main__":
    key = jax.random.PRNGKey(0)
    k1, k2, k3, k4 = jax.random.split(key, 4)

    # Primary config: NCHW logits, list alpha, mean reduction.
    N, C, H, W = 2, 4, 16, 16
    logits = jax.random.normal(k1, (N, C, H, W), dtype=jnp.float32)
    target = jax.random.randint(k2, (N, H, W), 0, C, dtype=jnp.int32)
    alpha = [0.1, 0.2, 0.3, 0.4]

    out = focal_loss(logits, target, gamma=2.0, alpha=alpha, size_average=True)
    out = jax.block_until_ready(out)
    ref = _focal_loss_ref(logits, target, gamma=2.0, alpha=alpha,
                          size_average=True)
    assert jnp.allclose(out, ref, rtol=1e-5, atol=1e-5), (out, ref)

    # No alpha, sum reduction.
    out2 = focal_loss(logits, target, gamma=2.0, alpha=None,
                      size_average=False)
    out2 = jax.block_until_ready(out2)
    ref2 = _focal_loss_ref(logits, target, gamma=2.0, alpha=None,
                           size_average=False)
    assert jnp.allclose(out2, ref2, rtol=1e-5, atol=1e-4), (out2, ref2)

    # Ragged spatial tiles (S = 17*17 = 289 with tile_s = 128) exercise the
    # in-kernel column mask instead of padding.
    H2 = W2 = 17
    logits3 = jax.random.normal(k3, (N, C, H2, W2), dtype=jnp.float32)
    target3 = jax.random.randint(k4, (N, H2, W2), 0, C, dtype=jnp.int32)
    out3 = focal_loss(logits3, target3, gamma=2.0, alpha=alpha,
                      size_average=True, max_tile_s=128)
    out3 = jax.block_until_ready(out3)
    ref3 = _focal_loss_ref(logits3, target3, gamma=2.0, alpha=alpha,
                           size_average=True)
    assert jnp.allclose(out3, ref3, rtol=1e-5, atol=1e-5), (out3, ref3)

    print("KERNEL_OK")
</pallas_src>

<mosaic_0001>
module attributes {stable_mosaic.version = 11 : i64} {
  func.func @_focal_loss_kernel(%arg0: i32, %arg1: i32, %arg2: memref<1x4x256xf32, #tpu.memory_space<vmem>>, %arg3: memref<1x1x256xi32, #tpu.memory_space<vmem>>, %arg4: memref<4x1xf32, #tpu.memory_space<vmem>>, %arg5: memref<1x1xf32, #tpu.memory_space<vmem>>, %arg6: memref<1x256xf32, #tpu.memory_space<vmem>>) attributes {dimension_semantics = [#tpu.dimension_semantics<arbitrary>, #tpu.dimension_semantics<arbitrary>], iteration_bounds = array<i64: 2, 1>, scalar_prefetch = 0 : i64, scratch_operands = 1 : i64, tpu.core_type = #tpu.core_type<tc>, window_params = [{transform_indices = @transform_0, window_bounds = array<i64: 1, 4, 256>}, {transform_indices = @transform_1, window_bounds = array<i64: 1, 1, 256>}, {pipeline_mode = #tpu.pipeline_mode<synchronous>, transform_indices = @transform_2, window_bounds = array<i64: 4, 1>}, {pipeline_mode = #tpu.pipeline_mode<synchronous>, transform_indices = @transform_3, window_bounds = array<i64: 1, 1>}]} {
    %c0_i32 = arith.constant 0 : i32
    %0 = arith.cmpi eq, %arg0, %c0_i32 : i32
    %c0_i32_0 = arith.constant 0 : i32
    %1 = arith.cmpi eq, %arg1, %c0_i32_0 : i32
    %2 = arith.andi %0, %1 : i1
    %3 = arith.extui %2 : i1 to i32
    %c0_i32_1 = arith.constant 0 : i32
    %4 = arith.cmpi ne, %3, %c0_i32_1 : i32
    scf.if %4 {
      %cst_23 = arith.constant 0.000000e+00 : f32
      %52 = vector.broadcast %cst_23 : f32 to vector<1x256xf32>
      %c0_24 = arith.constant 0 : index
      %c0_25 = arith.constant 0 : index
      %53 = vector.load %arg6[%c0_24, %c0_25] : memref<1x256xf32, #tpu.memory_space<vmem>>, vector<1x256xf32>
      tpu.vector_store %arg6[%c0_24, %c0_25], %52 {strides = array<i32>} : memref<1x256xf32, #tpu.memory_space<vmem>>, vector<1x256xf32>,
    } else {
    }
    %c0 = arith.constant 0 : index
    %c0_2 = arith.constant 0 : index
    %c0_3 = arith.constant 0 : index
    %5 = vector.load %arg2[%c0, %c0_2, %c0_3] : memref<1x4x256xf32, #tpu.memory_space<vmem>>, vector<1x4x256xf32>
    %6 = vector.shape_cast %5 : vector<1x4x256xf32> to vector<4x256xf32>
    %c0_4 = arith.constant 0 : index
    %c0_5 = arith.constant 0 : index
    %c0_6 = arith.constant 0 : index
    %7 = vector.load %arg3[%c0_4, %c0_5, %c0_6] : memref<1x1x256xi32, #tpu.memory_space<vmem>>, vector<1x1x256xi32>
    %8 = vector.shape_cast %7 : vector<1x1x256xi32> to vector<1x256xi32>
    %c0_7 = arith.constant 0 : index
    %c0_8 = arith.constant 0 : index
    %9 = vector.load %arg4[%c0_7, %c0_8] : memref<4x1xf32, #tpu.memory_space<vmem>>, vector<4x1xf32>
    %cst = arith.constant dense<0xFF800000> : vector<256xf32>
    %10 = vector.multi_reduction <maximumf>, %6, %cst [0] : vector<4x256xf32> to vector<256xf32>
    %11 = vector.shape_cast %10 : vector<256xf32> to vector<1x256xf32>
    %12 = vector.broadcast %11 : vector<1x256xf32> to vector<4x256xf32>
    %13 = arith.subf %6, %12 : vector<4x256xf32>
    %14 = math.exp %13 : vector<4x256xf32>
    %cst_9 = arith.constant dense<0.000000e+00> : vector<256xf32>
    %15 = vector.multi_reduction <add>, %14, %cst_9 [0] : vector<4x256xf32> to vector<256xf32>
    %16 = vector.shape_cast %15 : vector<256xf32> to vector<1x256xf32>
    %17 = math.log %16 : vector<1x256xf32>
    %18 = tpu.iota {dimensions = array<i32: 0>} : vector<4x256xi32>
    %19 = vector.broadcast %8 : vector<1x256xi32> to vector<4x256xi32>
    %20 = arith.cmpi eq, %18, %19 : vector<4x256xi32>
    %cst_10 = arith.constant 0.000000e+00 : f32
    %21 = vector.broadcast %cst_10 : f32 to vector<4x256xf32>
    %22 = arith.select %20, %14, %21 : vector<4x256xi1>, vector<4x256xf32>
    %cst_11 = arith.constant dense<0.000000e+00> : vector<256xf32>
    %23 = vector.multi_reduction <add>, %22, %cst_11 [0] : vector<4x256xf32> to vector<256xf32>
    %24 = vector.shape_cast %23 : vector<256xf32> to vector<1x256xf32>
    %25 = arith.divf %24, %16 : vector<1x256xf32>
    %26 = vector.broadcast %11 : vector<1x256xf32> to vector<4x256xf32>
    %27 = arith.subf %6, %26 : vector<4x256xf32>
    %28 = vector.broadcast %17 : vector<1x256xf32> to vector<4x256xf32>
    %29 = arith.subf %27, %28 : vector<4x256xf32>
    %30 = vector.broadcast %9 : vector<4x1xf32> to vector<4x256xf32>
    %31 = arith.mulf %29, %30 : vector<4x256xf32>
    %cst_12 = arith.constant 0.000000e+00 : f32
    %32 = vector.broadcast %cst_12 : f32 to vector<4x256xf32>
    %33 = arith.select %20, %31, %32 : vector<4x256xi1>, vector<4x256xf32>
    %cst_13 = arith.constant dense<0.000000e+00> : vector<256xf32>
    %34 = vector.multi_reduction <add>, %33, %cst_13 [0] : vector<4x256xf32> to vector<256xf32>
    %35 = vector.shape_cast %34 : vector<256xf32> to vector<1x256xf32>
    %cst_14 = arith.constant 1.000000e+00 : f32
    %36 = vector.broadcast %cst_14 : f32 to vector<1x256xf32>
    %37 = arith.subf %36, %25 : vector<1x256xf32>
    %cst_15 = arith.constant 0.000000e+00 : f32
    %38 = vector.broadcast %cst_15 : f32 to vector<1x256xf32>
    %39 = arith.maximumf %37, %38 : vector<1x256xf32>
    %40 = arith.mulf %39, %39 : vector<1x256xf32>
    %cst_16 = arith.constant 0.000000e+00 : f32
    %41 = vector.broadcast %cst_16 : f32 to vector<1x256xf32>
    %42 = arith.subf %41, %40 : vector<1x256xf32>
    %43 = arith.mulf %42, %35 : vector<1x256xf32>
    %c0_17 = arith.constant 0 : index
    %c0_18 = arith.constant 0 : index
    %44 = vector.load %arg6[%c0_17, %c0_18] : memref<1x256xf32, #tpu.memory_space<vmem>>, vector<1x256xf32>
    %45 = arith.addf %44, %43 : vector<1x256xf32>
    %c0_19 = arith.constant 0 : index
    %c0_20 = arith.constant 0 : index
    %46 = vector.load %arg6[%c0_19, %c0_20] : memref<1x256xf32, #tpu.memory_space<vmem>>, vector<1x256xf32>
    tpu.vector_store %arg6[%c0_19, %c0_20], %45 {strides = array<i32>} : memref<1x256xf32, #tpu.memory_space<vmem>>, vector<1x256xf32>,
    %c1_i32 = arith.constant 1 : i32
    %47 = arith.cmpi eq, %arg0, %c1_i32 : i32
    %c0_i32_21 = arith.constant 0 : i32
    %48 = arith.cmpi eq, %arg1, %c0_i32_21 : i32
    %49 = arith.andi %47, %48 : i1
    %50 = arith.extui %49 : i1 to i32
    %c0_i32_22 = arith.constant 0 : i32
    %51 = arith.cmpi ne, %50, %c0_i32_22 : i32
    scf.if %51 {
      %c0_23 = arith.constant 0 : index
      %c0_24 = arith.constant 0 : index
      %52 = vector.load %arg6[%c0_23, %c0_24] : memref<1x256xf32, #tpu.memory_space<vmem>>, vector<1x256xf32>
      %cst_25 = arith.constant dense<0.000000e+00> : vector<1xf32>
      %53 = vector.multi_reduction <add>, %52, %cst_25 [1] : vector<1x256xf32> to vector<1xf32>
      %54 = vector.shape_cast %53 : vector<1xf32> to vector<1x1xf32>
      %cst_26 = arith.constant 5.120000e+02 : f32
      %55 = vector.broadcast %cst_26 : f32 to vector<1x1xf32>
      %56 = arith.divf %54, %55 : vector<1x1xf32>
      %c0_27 = arith.constant 0 : index
      %c0_28 = arith.constant 0 : index
      %57 = vector.load %arg5[%c0_27, %c0_28] : memref<1x1xf32, #tpu.memory_space<vmem>>, vector<1x1xf32>
      tpu.vector_store %arg5[%c0_27, %c0_28], %56 {strides = array<i32>} : memref<1x1xf32, #tpu.memory_space<vmem>>, vector<1x1xf32>,
    } else {
    }
    return
  }
  func.func @transform_0(%arg0: i32, %arg1: i32) -> (i32, i32, i32) {
    %c0_i32 = arith.constant 0 : i32
    %c0_i32_0 = arith.constant 0 : i32
    return %arg0, %c0_i32, %arg1 : i32, i32, i32
  }
  func.func @transform_1(%arg0: i32, %arg1: i32) -> (i32, i32, i32) {
    %c0_i32 = arith.constant 0 : i32
    %c0_i32_0 = arith.constant 0 : i32
    return %arg0, %c0_i32, %arg1 : i32, i32, i32
  }
  func.func @transform_2(%arg0: i32, %arg1: i32) -> (i32, i32) {
    %c0_i32 = arith.constant 0 : i32
    %c0_i32_0 = arith.constant 0 : i32
    %c0_i32_1 = arith.constant 0 : i32
    return %c0_i32, %c0_i32_0 : i32, i32
  }
  func.func @transform_3(%arg0: i32, %arg1: i32) -> (i32, i32) {
    %c0_i32 = arith.constant 0 : i32
    %c0_i32_0 = arith.constant 0 : i32
    %c0_i32_1 = arith.constant 0 : i32
    return %c0_i32, %c0_i32_0 : i32, i32
  }
}

</mosaic_0001>

<bundles_post_ra>
// kernel: tpu_custom_call.1
= control target key start
LH: loop header
LB: loop body
LE: loop exit
PB: predicated region body
PF: predicated region fallthrough
CT: control target
= control target key end

     0   :  { %8 = vsyncpa [#allocation4], 0  ;;  %s933_s0 = inlined_call_operand.hbm [shape: f32[2,4,256], index: 0, kind: input, shape index: {}]   ;;  %s934_s1 = inlined_call_operand.vmem [shape: s32[2,1,256], index: 1, kind: input, shape index: {}]   ;;  %s935_s2 = inlined_call_operand.vmem [shape: f32[4,1], index: 2, kind: input, shape index: {}]   ;;  %s936_s3 = inlined_call_operand.hbm [shape: f32[1,1], index: 3, kind: output, shape index: {}]  }
   0x1   :  { %10 = vsyncpa [#allocation4 + $0x1], 0 }
   0x2   :  { %11 = vsyncpa [#allocation5], 0  ;;  %s734_s12 = smov 0   ;;  %s736_s13 = smov 0  }
   0x3   :  { %s738_s14 = smov 0   ;;  %s740_s15 = smov 0  }
   0x4   :  { %s742_s16 = smov 0   ;;  %s744_s17 = smov 0  }
   0x5 LB: > { %s500_s18 = sadd.s32 4294967295, %s706_s17   ;;  %s29_s19 = sadd.s32 1, %s702_s16  ;;  %s706_s17 = sphi %s744_s17, %s17_s17   ;;  %s702_s16 = sphi %s742_s16, %s947_s16   ;;  %s698_s15 = sphi %s740_s15, %s946_s15   ;;  %s694_s14 = sphi %s738_s14, %s945_s14   ;;  %s690_s13 = sphi %s736_s13, %s944_s13   ;;  %s686_s12 = sphi %s734_s12, %s943_s12  }
   0x6   : > { %p31_p0 = scmp.ge.s32.totalorder %s29_s19, 2  ;;  %s38_s20 = sadd.s32 1, %s694_s14 }
   0x7   : > { %p45_p1 = scmp.ne.s32.totalorder %s694_s14, %s690_s13  ;;  %p46_p2 = scmp.eq.s32.totalorder %s706_s17, 0 }
   0x8   : > { %s949_s19 = smov (%p31_p0, %s29_s19), 0  ;;  %p51_p4 = scmp.ne.s32.totalorder %s690_s13, %s686_s12 }
   0x9   : > { %p770_p3 = por %p46_p2, %p45_p1  ;;  %s33_s22 = ssub.s32 %s702_s16, %s949_s19 }
   0xa   : > { %p52_p5 = scmp.eq.s32.totalorder %s500_s18, 0  ;;  %p36_p6 = scmp.eq.s32.totalorder %s33_s22, 0 }
   0xb   : > { %p528_p8 = scmp.lt.s32.totalorder %s706_s17, 2  ;;  %s148_s25 = sand.u32 1, %s694_s14  }
   0xc   : > { %p779_p7 = por %p52_p5, %p51_p4  ;;  %s515_s26 = sshll.u32 %s702_s16, 7 }
   0xd   : > { %s785_s24 = scalar_select %p36_p6, %s694_s14, %s38_s20  }
   0xe   : > { %s503_s27 = sshll.u32 %s148_s25, 3  ;;  %s792_s30 = scalar_lea.hbm %s933_s0, %s515_s26 }
   0xf   : > { %s152_s4 = scalar_lea.vmem [#allocation3], %s503_s27  ;;  %p796_p9 = pnand %p528_p8, %p770_p3 }
  0x10   : > { %s162_s5 = sshll.u32 %s152_s4, 4  ;;  %s149_s7 = scalar_lea.sflag [#allocation4], %s148_s25  ;;  %s800_s5 = int_to_ptr.vmem [resolvable:$true] %s162_s5 }
  0x11   : > { %s596_s8 = scalar_lea.hbm %s792_s30, 128  ;;  %p598_p13 = pneg %p796_p9 }
  0x12   : > { %p597_p12 = scmp.ne.s32.totalorder %s792_s30, %s596_s8  ;;  %s601_s11 = scalar_lea.hbm %s933_s0, 256 }
  0x13   : > { %p602_p2 = scmp.lt.u32.totalorder %s792_s30, %s933_s0  ;;  %p603_p3 = scmp.lt.u32.totalorder %s601_s11, %s596_s8 }
  0x14   : > { %p599_p0 = pnand %p598_p13, %p597_p12  ;;  %p605_p5 = scmp.lt.u32.totalorder %s596_s8, %s792_s30 }
  0x15   : > { %p604_p4 = por %p603_p3, %p602_p2 }
  0x16   : > { %p600_p1 = pneg %p599_p0 }
  0x17   : > { %p606_p6 = por %p605_p5, %p604_p4 }
  0x19   : > { %p607_p8 = pnand %p606_p6, %p600_p1 }
  0x1b   : > { %610 = shalt.err (!%p607_p8)
}
  0x1c   : > { %s611_s21 = scalar_lea.vmem %s800_s5, 128  ;;  %s708_s22 = smov [#allocation3]  }
  0x1d   : > { %p612_p12 = scmp.ne.s32.totalorder %s800_s5, %s611_s21  ;;  %s616_s25 = sshll.u32 %s708_s22, 4  ;;  %s617_s25 = int_to_ptr.vmem [resolvable:$false] %s616_s25 }
  0x1e   : > { %s618_s26 = scalar_lea.vmem %s617_s25, 256  ;;  %p619_p11 = scmp.lt.s32.totalorder %s800_s5, %s617_s25 }
  0x1f   : > { %p614_p0 = pnand %p612_p12, %p598_p13  ;;  %p620_p2 = scmp.lt.s32.totalorder %s618_s26, %s611_s21 }
  0x21   : > { %p615_p10 = pneg %p614_p0  ;;  %p621_p3 = por %p620_p2, %p619_p11 }
  0x23   : > { %p622_p4 = pnand %p621_p3, %p615_p10 }
  0x25   : > { %625 = shalt.err (!%p622_p4)
}
  0x26   : > { %527 = dma.hbm_to_vmem [thread:$0]  (!%p796_p9), %s792_s30, 128, %s800_s5, %s149_s7  }
  0x27   : > { %p940_p1 = scmp.lt.s32.totalorder %s706_s17, 3  ;;  %p941_p5 = scmp.ge.s32.totalorder %s706_s17, 1 }
  0x29   : > { %p180_p13 = pnand %p941_p5, %p940_p1 }
  0x2a   : > { %s185_s27 = sand.u32 (!%p180_p13), 1, %s690_s13  }
  0x2b   : > { %183 = sbr.rel (%p180_p13) target bundleno = 404 (0x194), region = 32  ;;  %s507_s28 = sshll.u32 (!%p180_p13), %s185_s27, 3 }
  0x2c   : > { %s186_s29 = scalar_lea.sflag (!%p180_p13), [#allocation4], %s185_s27  ;;  %s189_s4 = scalar_lea.vmem (!%p180_p13), [#allocation3], %s507_s28 }
  0x32   : > { %677 = dma.done.wait (%p779_p7), %s186_s29, 128  }
  0x33   : > { %679 = vsyncadd (%p779_p7), %s186_s29, 4294967168  ;;  %p217_p10 = scmp.lt.s32.totalorder %s698_s15, 1  ;;  %p225_p9 = scmp.eq.s32.totalorder %s698_s15, 0 }
  0x34   : > { %v231_v0 = vlaneseq (%p225_p9)  ;;  %v709_v1 = vmov (%p225_p9), 0.0  }
  0x35   : > { %s218_s30 = scalar_select %p217_p10, %s698_s15, 1 }
  0x36   : > { %230 = sbr.rel (!%p225_p9) target bundleno = 61 (0x3d), region = 40  ;;  %vm233_vm0 = vcmp.lt.s32.totalorder (%p225_p9), %v231_v0, 256 }
  0x37   : > { %s508_s5 = sshll.u32 %s218_s30, 1  ;;  %235 = vst.msk [vmem:[#allocation2] sm:$0x3] (%p225_p9), %vm233_vm0, %v709_v1 }
  0x38   : > { %s844_s8 = scalar_lea.vmem %s934_s1, %s508_s5 }
  0x3d PF: > { %v238_v2 = vld [vmem:[%s935_s2] sm:$0xf]  ;;  %v710_v3 = vmov 0   ;;  %vm242_vm1 = vcmask 1043456   ;;  %p389_p7 = scmp.eq.s32.totalorder %s698_s15, 1  ;;  %v285_v27 = vlaneseq }
  0x3e   : > { %584 = vset.pattern.permute.xlu0 %v710_v3  ;;  %v236_v4 = vld [vmem:[%s189_s4] sm:$0xff]  ;;  %v237_v35 = vld [vmem:[%s844_s8] sm:$0x3]  ;;  %v711_v58 = vmov 839922192   ;;  %vm406_vm5 = vcmask (%p389_p7), 1040384  }
  0x3f   : > { %324 = vperm.xlu0 %584, %v238_v2   ;;  %v240_v5 = vcombine.high %v236_v4, %v236_v4  ;;  %v243_v6 = vsel %vm242_vm1, %v236_v4, -inf  ;;  %v855_v30 = vshrl.u32 %v285_v27, 7  ;;  %v327_v59 = vunpack.c.l.s4 %v711_v58 }
  0x40   : > { %v244_v8 = vrot.slane %v243_v6, 4  ;;  %vm386_vm4 = vcmp.lt.s32.totalorder %v285_v27, 256  ;;  %vm414_vm6 = vcmask (%p389_p7), 0  }
  0x41   : > { %v250_v7 = vsel %vm242_vm1, %v240_v5, -inf  ;;  %v289_v33 = vsub.s32 0, %v855_v30  ;;  %v293_v34 = vsub.s32 1, %v855_v30  ;;  %v328_v0 = vunpack.c.0.s8 %v327_v59 }
  0x42   : > { %v251_v9 = vrot.slane %v250_v7, 4  ;;  %v245_v10 = vmax.f32 %v243_v6, %v244_v8 }
  0x43   : > { %v290_v38 = vrot.slane %v237_v35, %v289_v33  ;;  %v294_v39 = vrot.slane %v237_v35, %v293_v34  ;;  %v331_v5 = vsub.s32 %v328_v0, %v855_v30 }
  0x44   : > { %v252_v11 = vmax.f32 %v250_v7, %v251_v9  ;;  %v246_v12 = vrot.slane %v245_v10, 2 }
  0x45   : > { %vm295_vm2 = vcmp.eq.s32.totalorder %v855_v30, %v290_v38  ;;  %vm296_vm3 = vcmp.eq.s32.totalorder %v855_v30, %v294_v39 }
  0x46   : > { %v253_v13 = vrot.slane %v252_v11, 2  ;;  %v247_v14 = vmax.f32 %v245_v10, %v246_v12 }
  0x48   : > { %v254_v15 = vmax.f32 %v252_v11, %v253_v13  ;;  %v248_v16 = vrot.slane %v247_v14, 1 }
  0x4a   : > { %v255_v17 = vrot.slane %v254_v15, 1  ;;  %v249_v18 = vmax.f32 %v247_v14, %v248_v16 }
  0x4c   : > { %v256_v19 = vmax.f32 %v254_v15, %v255_v17 }
  0x4e   : > { %v259_v20 = vcombine.low %v249_v18, %v256_v19 }
  0x50   : > { %v261_v21 = vsub.f32 %v236_v4, %v259_v20 }
  0x52   : > { %v262_v22 = vmul.f32 1.442695, %v261_v21 }
  0x54   : > { %586 = vpow2.f32 %v262_v22 }
  0x5e   : > { %v587_v23 = vpop.eup %586 }
  0x5f   : > { %v265_v24 = vcombine.high %v587_v23, %v587_v23  ;;  %v267_v25 = vsel %vm242_vm1, %v587_v23, 0.0  ;;  %v297_v44 = vsel %vm295_vm2, %v587_v23, 0.0 }
  0x60   : > { %v268_v28 = vrot.slane %v267_v25, 4  ;;  %v299_v48 = vsel %vm242_vm1, %v297_v44, 0.0 }
  0x61   : > { %v274_v26 = vsel %vm242_vm1, %v265_v24, 0.0  ;;  %v298_v45 = vsel %vm296_vm3, %v265_v24, 0.0  ;;  %v300_v50 = vrot.slane %v299_v48, 4 }
  0x62   : > { %v275_v29 = vrot.slane %v274_v26, 4  ;;  %v269_v31 = vadd.f32 %v268_v28, %v267_v25  ;;  %v306_v49 = vsel %vm242_vm1, %v298_v45, 0.0 }
  0x63   : > { %v307_v51 = vrot.slane %v306_v49, 4  ;;  %v301_v52 = vadd.f32 %v300_v50, %v299_v48 }
  0x64   : > { %v276_v32 = vadd.f32 %v275_v29, %v274_v26  ;;  %v270_v36 = vrot.slane %v269_v31, 2 }
  0x65   : > { %v308_v53 = vadd.f32 %v307_v51, %v306_v49  ;;  %v302_v54 = vrot.slane %v301_v52, 2 }
  0x66   : > { %v277_v37 = vrot.slane %v276_v32, 2  ;;  %v271_v40 = vadd.f32 %v270_v36, %v269_v31  ;;  %v712_v31 = vmov 1966171168  }
  0x67   : > { %v309_v55 = vrot.slane %v308_v53, 2  ;;  %v303_v60 = vadd.f32 %v302_v54, %v301_v52  ;;  %v364_v52 = vld [vmem:[#allocation2] sm:$0x3] }
  0x68   : > { %v278_v41 = vadd.f32 %v277_v37, %v276_v32  ;;  %v272_v42 = vrot.slane %v271_v40, 1  ;;  %v369_v32 = vunpack.c.l.s4 %v712_v31 }
  0x69   : > { %v310_v61 = vadd.f32 %v309_v55, %v308_v53  ;;  %v304_v1 = vrot.slane %v303_v60, 1 }
  0x6a   : > { %v279_v43 = vrot.slane %v278_v41, 1  ;;  %v273_v46 = vadd.f32 %v272_v42, %v271_v40  ;;  %v370_v42 = vunpack.c.0.s8 %v369_v32 }
  0x6b   : > { %v311_v2 = vrot.slane %v310_v61, 1  ;;  %v305_v6 = vadd.f32 %v304_v1, %v303_v60 }
  0x6c   : > { %v280_v47 = vadd.f32 %v279_v43, %v278_v41  ;;  %588 = vlog2.f32 %v273_v46 }
  0x6d   : > { %v312_v7 = vadd.f32 %v311_v2, %v310_v61 }
  0x6e   : > { %590 = vlog2.f32 %v280_v47 }
  0x6f   : > { %592 = vrcp.f32 %v273_v46 }
  0x70   : > { %594 = vrcp.f32 %v280_v47  ;;  %v373_v47 = vsub.s32 %v370_v42, %v855_v30 }
  0x76   : > { %v589_v56 = vpop.eup %588 }
  0x77   : > { %v282_v62 = vmul.f32 0.6931472, %v589_v56 }
  0x78   : > { %v591_v57 = vpop.eup %590 }
  0x79   : > { %v284_v63 = vmul.f32 0.6931472, %v591_v57  ;;  %v593_v4 = vpop.eup %592 }
  0x7a   : > { %v595_v8 = vpop.eup %594  ;;  %v314_v11 = vmul.f32 %v593_v4, %v305_v6 }
  0x7b   : > { %v319_v3 = vcombine.low %v282_v62, %v284_v63  ;;  %v316_v12 = vmul.f32 %v595_v8, %v312_v7 }
  0x7c   : > { %v354_v17 = vsub.f32 1.0, %v314_v11 }
  0x7d   : > { %v321_v9 = vsub.f32 %v261_v21, %v319_v3  ;;  %v355_v18 = vsub.f32 1.0, %v316_v12 }
  0x7e   : > { %v356_v25 = vmax.f32 %v354_v17, 0.0 }
  0x7f   : > { %v357_v26 = vmax.f32 %v355_v18, 0.0 }
  0x80   : > { %v358_v37 = vmul.f32 %v356_v25, %v356_v25 }
  0x81   : > { %v359_v38 = vmul.f32 %v357_v26, %v357_v26 }
  0x82   : > { %v360_v44 = vsub.f32 0.0, %v358_v37 }
  0x83   : > { %v361_v45 = vsub.f32 0.0, %v359_v38 }
  0xbe   : > { %v325_v10 = vpop.permute.xlu0 %324 }
  0xbf   : > { %v332_v13 = vrot.slane %v325_v10, %v331_v5 }
  0xc1   : > { %v334_v14 = vmul.f32 %v332_v13, %v321_v9 }
  0xc3   : > { %v336_v15 = vcombine.high %v334_v14, %v334_v14  ;;  %v338_v16 = vsel %vm295_vm2, %v334_v14, 0.0 }
  0xc4   : > { %v340_v19 = vsel %vm242_vm1, %v338_v16, 0.0 }
  0xc5   : > { %v339_v20 = vsel %vm296_vm3, %v336_v15, 0.0  ;;  %v341_v22 = vrot.slane %v340_v19, 4 }
  0xc6   : > { %v347_v23 = vsel %vm242_vm1, %v339_v20, 0.0 }
  0xc7   : > { %v342_v21 = vadd.f32 %v341_v22, %v340_v19  ;;  %v348_v24 = vrot.slane %v347_v23, 4 }
  0xc9   : > { %v343_v28 = vrot.slane %v342_v21, 2  ;;  %v349_v29 = vadd.f32 %v348_v24, %v347_v23 }
  0xcb   : > { %v344_v35 = vadd.f32 %v343_v28, %v342_v21  ;;  %v350_v36 = vrot.slane %v349_v29, 2 }
  0xcd   : > { %v345_v40 = vrot.slane %v344_v35, 1  ;;  %v351_v41 = vadd.f32 %v350_v36, %v349_v29 }
  0xcf   : > { %v346_v39 = vadd.f32 %v345_v40, %v344_v35  ;;  %v352_v43 = vrot.slane %v351_v41, 1 }
  0xd1   : > { %v353_v46 = vadd.f32 %v352_v43, %v351_v41  ;;  %v362_v48 = vmul.f32 %v360_v44, %v346_v39 }
  0xd3   : > { %v363_v49 = vmul.f32 %v361_v45, %v353_v46 }
  0xd5   : > { %v367_v50 = vcombine.low %v362_v48, %v363_v49 }
  0xd7   : > { %v374_v51 = vrot.slane %v367_v50, %v373_v47  ;;  %393 = sbr.rel (!%p389_p7) target bundleno = 379 (0x17b), region = 44 }
  0xd9   : > { %v381_v53 = vrot.slane %v374_v51, %v373_v47 }
  0xdb   : > { %v383_v54 = vadd.f32 %v381_v53, %v364_v52 }
  0xdd   : > { %388 = vst.msk [vmem:[#allocation2] sm:$0x3] %vm386_vm4, %v383_v54 }
  0xe4   : > { %v394_v55 = vld [vmem:[#allocation2] sm:$0x3] }
  0xe5   : > { %v399_v56 = vrot.slane %v394_v55, %v289_v33  ;;  %v403_v57 = vrot.slane %v394_v55, %v293_v34 }
  0xe7   : > { %v407_v58 = vsel %vm406_vm5, %v399_v56, 0.0  ;;  %v408_v59 = vsel %vm406_vm5, %v403_v57, 0.0 }
  0xe8   : > { %v409_v60 = vadd.f32 %v408_v59, %v407_v58 }
  0xea   : > { %410 = vadd.xlane.f32.xlu0 %v409_v60 }
 0x177   : > { %v411_v61 = vpop.xlane.xlu0 %410 }
 0x178   : > { %v413_v27 = vmul.f32 0.001953125, %v411_v61 }
 0x17a   : > { %415 = vst.msk [vmem:[#allocation6] sm:$0x1] %vm414_vm6, %v413_v27 }
 0x17b PF: > { %p889_p11 = scmp.eq.s32.totalorder %s500_s18, 1  ;;  %s713_s10 = smov [#allocation6]  }
 0x17c   : > { %s423_s11 = sshll.u32 %s713_s10, 4  ;;  %s424_s11 = int_to_ptr.vmem [resolvable:$true] %s423_s11 }
 0x17d   : > { %s626_s12 = scalar_lea.vmem %s424_s11, 16  ;;  %s632_s20 = scalar_lea.vmem %s424_s11, 32 }
 0x17e   : > { %p627_p6 = scmp.ne.s32.totalorder %s424_s11, %s626_s12  ;;  %p633_p0 = scmp.lt.s32.totalorder %s424_s11, %s424_s11 }
 0x17f   : > { %p634_p2 = scmp.lt.s32.totalorder %s632_s20, %s626_s12 }
 0x180   : > { %p628_p8 = pnand %p627_p6, %p889_p11 }
 0x181   : > { %p635_p3 = por %p634_p2, %p633_p0 }
 0x182   : > { %p629_p12 = pneg %p628_p8 }
 0x184   : > { %p636_p4 = pnand %p635_p3, %p629_p12 }
 0x186   : > { %639 = shalt.err (!%p636_p4)
}
 0x187   : > { %s640_s22 = scalar_lea.hbm %s936_s3, 16 }
 0x188   : > { %p641_p1 = scmp.ne.s32.totalorder %s936_s3, %s640_s22  ;;  %p646_p10 = scmp.lt.u32.totalorder %s640_s22, %s936_s3 }
 0x18a   : > { %p642_p5 = pnand %p641_p1, %p889_p11 }
 0x18c   : > { %p643_p13 = pneg %p642_p5 }
 0x18e   : > { %p648_p9 = pnand %p646_p10, %p643_p13 }
 0x190   : > { %651 = shalt.err (!%p648_p9)
}
 0x191   : > { %521 = dma.vmem_to_hbm [thread:$0]  (%p889_p11), %s424_s11, 16, %s936_s3, [#allocation5]  }
 0x192   : > { %681 = dma.done.wait (%p889_p11), [#allocation5], 16  }
 0x193   : > { %683 = vsyncadd (%p889_p11), [#allocation5], 4294967280 }
 0x194 PF: > { %s17_s17 = sadd.s32 1, %s706_s17   ;;  %s943_s12 = smov %s690_s13 }
 0x195   : > { %p14_p7 = scmp.ge.s32.totalorder %s17_s17, 4   ;;  %s944_s13 = smov %s694_s14 }
 0x196   : > { %s945_s14 = smov %s785_s24  ;;  %s946_s15 = smov %s702_s16 }
 0x197   : > { %s947_s16 = smov %s949_s19  ;;  %16 = sbr.rel (!%p14_p7) target bundleno = 5 (0x5), region = 80 }
 0x19e   :  { %436 = vsyncpa [#allocation4], 1 }
 0x19f   :  { %438 = vsyncpa [#allocation4 + $0x1], 1 }
 0x1a0   :  { %439 = vsyncpa [#allocation5], 1 }
 0x1a1   :  { %441 = vsyncpa [#allocation5 + $0x1], 1 }

</bundles_post_ra>
